<compile_context>
chip_gen: v6e
topology: v6e:2x2x1
jax: 0.10.0
libtpu: 0.0.40
codegen_flags: <defaults>
</compile_context>

<pallas_src>
import jax
import jax.numpy as jnp
from jax.experimental import pallas as pl
from jax.experimental.pallas import tpu as pltpu


# --------------------------------------------------------------------------- #
# Kernel: one batch tile of  out = sigmoid(x @ W_eff + b_eff)
# --------------------------------------------------------------------------- #
def casper_kernel(x_ref, w_ref, b_ref, o_ref):
    """x_ref: (TB, d_in), w_ref: (d_in, O_pad) lane-padded, b_ref: (1, O), o_ref: (TB, O)."""
    logic = jnp.dot(x_ref[...], w_ref[...],
                    preferred_element_type=jnp.float32)          # (TB, O_pad) MXU
    o = o_ref.shape[-1]
    o_ref[...] = jax.nn.sigmoid(logic[:, :o] + b_ref[...])       # unpadded store


# --------------------------------------------------------------------------- #
# Host-side prep: fold the whole cascade into (W_eff, b_eff).  Run ONCE per
# parameter set — keep it out of the per-forward-call path.
# --------------------------------------------------------------------------- #
def prepare_params(w_io_t, b_io, wh_pad, bh, wo, *, d_in, n_hidden, out_lane_pad=128):
    f32 = jnp.float32
    o = w_io_t.shape[1]
    w_eff = w_io_t.astype(f32)                                   # (d_in, O)
    b_eff = b_io.astype(f32).reshape(1, o)                       # (1, O)

    if n_hidden > 0:
        wxh = wh_pad[:, :d_in].T.astype(f32)                     # (d_in, nh)
        # strictly-lower-tri coupling C[i, j] = w_i[d_in + j] for j < i
        c = jnp.tril(wh_pad[:, d_in:d_in + n_hidden], k=-1).astype(f32)   # (nh, nh)
        wo_f = wo.astype(f32)                                    # (nh, O)

        # A = (I - C^T)^-1 @ Wo via exact back-substitution (unit upper-triangular):
        #   A[i] = Wo[i] + sum_{j>i} C[j, i] * A[j]
        a_rows = [None] * n_hidden
        for i in reversed(range(n_hidden)):
            a = wo_f[i]
            for j in range(i + 1, n_hidden):
                a = a + c[j, i] * a_rows[j]
            a_rows[i] = a
        a = jnp.stack(a_rows, axis=0)                            # (nh, O)

        w_eff = w_eff + wxh @ a                                  # (d_in, O)
        b_eff = b_eff + bh.astype(f32) @ a                       # (1, O)

    # Lane-pad only the resident weight (keeps the MXU path clean); output stays unpadded.
    o_pad = pl.cdiv(o, out_lane_pad) * out_lane_pad
    w_eff_pad = jnp.zeros((d_in, o_pad), f32).at[:, :o].set(w_eff)
    return w_eff_pad, b_eff


# --------------------------------------------------------------------------- #
# Per-call wrapper: batch tiling + pallas_call (no weight plumbing here).
# --------------------------------------------------------------------------- #
def casper_forward(x, w_eff_pad, b_eff, *, max_batch_tile=2048):
    f32 = jnp.float32
    b, d_in = x.shape
    o = b_eff.shape[1]
    o_pad = w_eff_pad.shape[1]

    b_pad8 = pl.cdiv(b, 8) * 8
    tb = min(max_batch_tile, b_pad8)
    # v7x megacore: once the batch is big enough, ensure >= 2 tiles so the
    # "parallel" grid axis can be sharded across both TensorCores.
    if b_pad8 >= 256 and b_pad8 // tb < 2:
        tb = pl.cdiv(pl.cdiv(b_pad8, 2), 8) * 8
    b_pad = pl.cdiv(b_pad8, tb) * tb

    x_p = x.astype(f32)
    if b_pad != b:
        x_p = jnp.zeros((b_pad, d_in), f32).at[:b, :].set(x_p)

    out = pl.pallas_call(
        casper_kernel,
        out_shape=jax.ShapeDtypeStruct((b_pad, o), f32),
        grid_spec=pltpu.PrefetchScalarGridSpec(
            num_scalar_prefetch=0,
            grid=(b_pad // tb,),
            in_specs=[
                pl.BlockSpec((tb, d_in), lambda i: (i, 0)),      # x batch tile
                pl.BlockSpec((d_in, o_pad), lambda i: (0, 0)),   # W_eff (VMEM resident)
                pl.BlockSpec((1, o), lambda i: (0, 0)),          # b_eff (VMEM resident)
            ],
            out_specs=pl.BlockSpec((tb, o), lambda i: (i, 0)),   # unpadded output tile
        ),
        compiler_params=pltpu.CompilerParams(
            dimension_semantics=("parallel",)),
    )(x_p, w_eff_pad, b_eff)

    return out[:b]


# --------------------------------------------------------------------------- #
# Pure-JAX reference mirroring the PyTorch forward loop.
# --------------------------------------------------------------------------- #
def reference_forward(x, w_io_t, b_io, wh_pad, bh, wo, *, d_in, n_hidden):
    neurons_all = x
    for i in range(n_hidden):
        wi = wh_pad[i, : d_in + i]                               # (d_in + i,)
        h = neurons_all[:, : d_in + i] @ wi[:, None] + bh[0, i]  # (B, 1)
        neurons_all = jnp.concatenate([neurons_all, h], axis=1)
    logic = x @ w_io_t + b_io
    for i in range(n_hidden):
        logic = logic + neurons_all[:, d_in + i:d_in + i + 1] * wo[i:i + 1, :]
    return jax.nn.sigmoid(logic)


def make_params(key, d_in, out_size, n_hidden):
    """Deterministic PyTorch-Linear-style init (uniform +/- 1/sqrt(fan_in))."""
    d_total = d_in + n_hidden
    keys = jax.random.split(key, 2 + 3 * max(n_hidden, 1))
    kidx = 0

    def unif(k, shape, fan_in):
        bound = 1.0 / jnp.sqrt(jnp.float32(fan_in))
        return jax.random.uniform(k, shape, jnp.float32, -bound, bound)

    # input_to_output: Linear(d_in, out_size)
    w_io = unif(keys[kidx], (out_size, d_in), d_in); kidx += 1
    b_io = unif(keys[kidx], (1, out_size), d_in); kidx += 1

    wh_rows, bh_vals, wo_rows = [], [], []
    for i in range(n_hidden):
        fan = d_in + i
        wi = unif(keys[kidx], (fan,), fan); kidx += 1
        bi = unif(keys[kidx], (), fan); kidx += 1
        wo_i = unif(keys[kidx], (out_size,), 1); kidx += 1       # Linear(1, O, bias=False)
        wh_rows.append(jnp.concatenate([wi, jnp.zeros((d_total - fan,), jnp.float32)]))
        bh_vals.append(bi)
        wo_rows.append(wo_i)

    w_io_t = w_io.T                                              # (d_in, O)
    if n_hidden > 0:
        wh_pad = jnp.stack(wh_rows, axis=0)                      # (n_hidden, d_total)
        bh = jnp.stack(bh_vals)[None, :]                         # (1, n_hidden)
        wo = jnp.stack(wo_rows, axis=0)                          # (n_hidden, O)
    else:
        wh_pad = jnp.zeros((0, d_total), jnp.float32)
        bh = jnp.zeros((1, 0), jnp.float32)
        wo = jnp.zeros((0, out_size), jnp.float32)
    return w_io_t, b_io, wh_pad, bh, wo


if __name__ == "__main__":
    B, D_IN, OUT, N_HIDDEN = 8, 16, 4, 3

    key = jax.random.PRNGKey(0)
    kx, kx2, kp = jax.random.split(key, 3)
    x = jax.random.normal(kx, (B, D_IN), jnp.float32)
    w_io_t, b_io, wh_pad, bh, wo = make_params(kp, D_IN, OUT, N_HIDDEN)

    # Host-side fold — done ONCE per parameter set, hoisted out of the per-call path.
    w_eff_pad, b_eff = prepare_params(w_io_t, b_io, wh_pad, bh, wo,
                                      d_in=D_IN, n_hidden=N_HIDDEN)

    out = jax.block_until_ready(casper_forward(x, w_eff_pad, b_eff))
    ref = reference_forward(x, w_io_t, b_io, wh_pad, bh, wo,
                            d_in=D_IN, n_hidden=N_HIDDEN)
    assert out.shape == (B, OUT)
    assert jnp.allclose(out, ref, atol=5e-5, rtol=5e-5), "mismatch vs reference"

    # Second small check: non-multiple-of-8 batch exercises the row-padding path.
    x2 = jax.random.normal(kx2, (20, D_IN), jnp.float32)
    out2 = jax.block_until_ready(casper_forward(x2, w_eff_pad, b_eff))
    ref2 = reference_forward(x2, w_io_t, b_io, wh_pad, bh, wo,
                             d_in=D_IN, n_hidden=N_HIDDEN)
    assert out2.shape == (20, OUT)
    assert jnp.allclose(out2, ref2, atol=5e-5, rtol=5e-5), "mismatch vs reference (B=20)"

    print("KERNEL_OK")
</pallas_src>

<mosaic_0001>
module attributes {stable_mosaic.version = 11 : i64} {
  func.func @casper_kernel(%arg0: i32, %arg1: memref<8x16xf32, #tpu.memory_space<vmem>>, %arg2: memref<16x128xf32, #tpu.memory_space<vmem>>, %arg3: memref<1x4xf32, #tpu.memory_space<vmem>>, %arg4: memref<8x4xf32, #tpu.memory_space<vmem>>) attributes {dimension_semantics = [#tpu.dimension_semantics<parallel>], iteration_bounds = array<i64: 1>, scalar_prefetch = 0 : i64, scratch_operands = 0 : i64, tpu.core_type = #tpu.core_type<tc>, window_params = [{transform_indices = @transform_0, window_bounds = array<i64: 8, 16>}, {pipeline_mode = #tpu.pipeline_mode<synchronous>, transform_indices = @transform_1, window_bounds = array<i64: 16, 128>}, {pipeline_mode = #tpu.pipeline_mode<synchronous>, transform_indices = @transform_2, window_bounds = array<i64: 1, 4>}, {transform_indices = @transform_3, window_bounds = array<i64: 8, 4>}]} {
    %c0 = arith.constant 0 : index
    %c0_0 = arith.constant 0 : index
    %0 = vector.load %arg1[%c0, %c0_0] : memref<8x16xf32, #tpu.memory_space<vmem>>, vector<8x16xf32>
    %c0_1 = arith.constant 0 : index
    %c0_2 = arith.constant 0 : index
    %1 = vector.load %arg2[%c0_1, %c0_2] : memref<16x128xf32, #tpu.memory_space<vmem>>, vector<16x128xf32>
    %cst = arith.constant dense<0.000000e+00> : vector<8x128xf32>
    %2 = tpu.matmul %0, %1, %cst {dimension_numbers = #tpu.dot_dimension_numbers<[1], [0], [0], [1], [0, 0, 1, 1], [], []>} : vector<8x16xf32>, vector<16x128xf32>, vector<8x128xf32> -> vector<8x128xf32>
    %3 = vector.extract_strided_slice %2 {offsets = [0, 0], sizes = [8, 4], strides = [1, 1]} : vector<8x128xf32> to vector<8x4xf32>
    %c0_3 = arith.constant 0 : index
    %c0_4 = arith.constant 0 : index
    %4 = vector.load %arg3[%c0_3, %c0_4] : memref<1x4xf32, #tpu.memory_space<vmem>>, vector<1x4xf32>
    %5 = vector.broadcast %4 : vector<1x4xf32> to vector<8x4xf32>
    %6 = arith.addf %3, %5 : vector<8x4xf32>
    %7 = arith.negf %6 : vector<8x4xf32>
    %8 = math.exp %7 : vector<8x4xf32>
    %cst_5 = arith.constant 1.000000e+00 : f32
    %9 = vector.broadcast %cst_5 : f32 to vector<8x4xf32>
    %10 = arith.addf %9, %8 : vector<8x4xf32>
    %11 = arith.divf %9, %10 : vector<8x4xf32>
    %c0_6 = arith.constant 0 : index
    %c0_7 = arith.constant 0 : index
    %12 = vector.load %arg4[%c0_6, %c0_7] : memref<8x4xf32, #tpu.memory_space<vmem>>, vector<8x4xf32>
    tpu.vector_store %arg4[%c0_6, %c0_7], %11 {strides = array<i32>} : memref<8x4xf32, #tpu.memory_space<vmem>>, vector<8x4xf32>,
    return
  }
  func.func @transform_0(%arg0: i32) -> (i32, i32) {
    %c0_i32 = arith.constant 0 : i32
    %c0_i32_0 = arith.constant 0 : i32
    return %arg0, %c0_i32 : i32, i32
  }
  func.func @transform_1(%arg0: i32) -> (i32, i32) {
    %c0_i32 = arith.constant 0 : i32
    %c0_i32_0 = arith.constant 0 : i32
    %c0_i32_1 = arith.constant 0 : i32
    return %c0_i32, %c0_i32_0 : i32, i32
  }
  func.func @transform_2(%arg0: i32) -> (i32, i32) {
    %c0_i32 = arith.constant 0 : i32
    %c0_i32_0 = arith.constant 0 : i32
    %c0_i32_1 = arith.constant 0 : i32
    return %c0_i32, %c0_i32_0 : i32, i32
  }
  func.func @transform_3(%arg0: i32) -> (i32, i32) {
    %c0_i32 = arith.constant 0 : i32
    %c0_i32_0 = arith.constant 0 : i32
    return %arg0, %c0_i32 : i32, i32
  }
}

</mosaic_0001>

<bundles_post_ra>
// kernel: tpu_custom_call.1
= control target key start
LH: loop header
LB: loop body
LE: loop exit
PB: predicated region body
PF: predicated region fallthrough
CT: control target
= control target key end

     0   :  { %8 = vsyncpa [#allocation3], 0  ;;  %s244_s0 = inlined_call_operand.hbm [shape: f32[8,16], index: 0, kind: input, shape index: {}]   ;;  %s245_s1 = inlined_call_operand.hbm [shape: f32[16,128], index: 1, kind: input, shape index: {}]   ;;  %s246_s2 = inlined_call_operand.vmem [shape: f32[1,4], index: 2, kind: input, shape index: {}]   ;;  %s247_s3 = inlined_call_operand.vmem [shape: f32[8,4], index: 3, kind: output, shape index: {}]  }
   0x1   :  { %9 = vsyncpa [#allocation5], 0  ;;  %s206_s12 = smov [#allocation2]   ;;  %s207_s14 = smov [#allocation4]  }
   0x2   :  { %s16_s13 = sshll.u32 %s206_s12, 4  ;;  %s25_s15 = sshll.u32 %s207_s14, 4  ;;  %s17_s13 = int_to_ptr.vmem [resolvable:$true] %s16_s13  ;;  %s26_s15 = int_to_ptr.vmem [resolvable:$true] %s25_s15 }
   0x3   :  { %s170_s16 = scalar_lea.vmem %s17_s13, 128  ;;  %p175_p1 = scmp.lt.s32.totalorder %s17_s13, %s17_s13 }
   0x4   :  { %p171_p0 = scmp.ne.s32.totalorder %s17_s13, %s170_s16  ;;  %p176_p2 = scmp.lt.s32.totalorder %s170_s16, %s170_s16 }
   0x6   :  { %p177_p3 = por %p176_p2, %p175_p1 }
   0x8   :  { %p178_p4 = pnand %p177_p3, %p171_p0 }
   0xa   :  { %181 = shalt.err (!%p178_p4)
}
   0xb   :  { %19 = dma.hbm_to_vmem [thread:$0]  %s244_s0, 128, %s17_s13, [#allocation3]  }
   0xc   :  { %s190_s19 = scalar_lea.vmem %s26_s15, 256  ;;  %p195_p6 = scmp.lt.s32.totalorder %s26_s15, %s26_s15 }
   0xd   :  { %p191_p5 = scmp.ne.s32.totalorder %s26_s15, %s190_s19  ;;  %p196_p7 = scmp.lt.s32.totalorder %s190_s19, %s190_s19 }
   0xf   :  { %p197_p8 = por %p196_p7, %p195_p6 }
  0x11   :  { %p198_p9 = pnand %p197_p8, %p191_p5 }
  0x13   :  { %201 = shalt.err (!%p198_p9)
}
  0x14   :  { %s208_s20 = smov 128   ;;  %s209_s21 = smov 8  }
  0x15   :  { %31 = dma.hbm_to_vmem [thread:$0]  %s245_s1, 256, %s26_s15, [#allocation5], %s208_s20, %s208_s20, %s209_s21  }
  0x16   :  { %202 = dma.done.wait [#allocation3], 128  }
  0x17   :  { %203 = vsyncadd [#allocation3], 4294967168 }
  0x18   :  { %204 = dma.done.wait [#allocation5], 256  }
  0x19   :  { %205 = vsyncadd [#allocation5], 4294967040  ;;  %v210_v0 = vmov 0.0   ;;  %vm211_vm0 = vmmov 0   ;;  %v42_v1 = vld [vmem:[#allocation4 + $0x8] sm:$0xff]  ;;  %v41_v2 = vld [vmem:[#allocation4] sm:$0xff] }
  0x1a   :  { %145 = vmatprep.subr.mxu0 %v210_v0  ;;  %149 = vmatprep.mubr.msk.f32.mxu0 %vm211_vm0, %v210_v0  ;;  %v40_v3 = vld [vmem:[#allocation2] sm:$0xff]  ;;  %vm43_vm1 = vcmask 130048   ;;  %vm131_vm2 = vcmask 31744  }
  0x1b   :  { %146 = vmatpush3.msra.mxu0 %v42_v1  ;;  %v140_v4 = vld [vmem:[%s246_s2] ss:$0 sm:$0xff] }
  0x1c   :  { %147 = vmatprep.subr.mxu0 %v210_v0 }
  0x1d   :  { %148 = vmatpush3.msra.mxu0 %v41_v2 }
  0x1e   :  { %150 = vmatmul.mubr.msk.f32.vlgmr.msra.gmra.mxu0 %vm43_vm1, %v40_v3 }
  0xde   :  { %v113_v5 = vpop.f32.mrf.mxu0 }
  0xdf   :  { %v124_v6 = vadd.f32 %v140_v4, %v113_v5 }
  0xe0   :  { %v151_v7 = vpop.f32.mrf.mxu0 }
  0xe1   :  { %v141_v8 = vmul.f32 -1.442695, %v124_v6 }
  0xe3   :  { %158 = vpow2.f32 %v141_v8 }
  0xf0   :  { %v159_v9 = vpop.eup %158 }
  0xf1   :  { %v128_v10 = vadd.f32 1.0, %v159_v9 }
  0xf3   :  { %160 = vrcp.f32 %v128_v10 }
 0x100   :  { %v161_v11 = vpop.eup %160 }
 0x101   :  { %132 = vst.msk [vmem:[%s247_s3] sm:$0xff] %vm131_vm2, %v161_v11 }
 0x102   :  { %137 = vsyncpa [#allocation3], 1 }
 0x103   :  { %138 = vsyncpa [#allocation5], 1 }

</bundles_post_ra>
